<compile_context>
chip_gen: v5e
topology: v5e:2x2
jax: 0.10.0
libtpu: 0.0.40
codegen_flags: <defaults>
</compile_context>

<pallas_src>
import jax
import jax.numpy as jnp
from jax import lax
from jax.experimental import pallas as pl
from jax.experimental.pallas import tpu as pltpu

_VMEM_LIMIT_BYTES = 32 * 1024 * 1024  # safe scoped-VMEM on v5e/v6e (128MiB) and v7x (64MiB)


# ----------------------------------------------------------------------------
# In-kernel helpers
# ----------------------------------------------------------------------------
def _silu(y):
    # y * sigmoid(y); exp and the approximate reciprocal both run on the EUP.
    return y * pl.reciprocal(1.0 + jnp.exp(-y), approx=True)


def _make_fused_kernel(plan):
    """One kernel for the whole stage.  `plan` is static per-block metadata that
    drives how the flat list of parameter refs is consumed; the body is fully
    unrolled at trace time, all intermediates stay in VMEM/vregs."""

    def kernel(x_ref, *refs):
        o_ref = refs[-1]
        prefs = refs[:-1]
        x = x_ref[0]                              # (H, W*C) f32, current activation
        idx = 0
        for blk in plan:
            if blk['type'] == 'down':
                # ConvKXBNRELU stride-2: silu(BN(conv)); H/W subsample folded into A/B.
                K = blk['K']
                a_ref, b_ref, bias_ref = prefs[idx:idx + 3]
                idx += 3
                xb = x.astype(jnp.bfloat16)
                acc = None
                for kh in range(K):
                    shifted = jnp.dot(a_ref[kh], xb,
                                      preferred_element_type=jnp.float32
                                      ).astype(jnp.bfloat16)
                    part = jnp.dot(shifted, b_ref[kh],
                                   preferred_element_type=jnp.float32)
                    acc = part if acc is None else acc + part
                x = _silu(acc + bias_ref[...])
            else:
                # ResConvKXKX stride-1:
                #   reslink = residual_proj(x); h = silu(conv1(x)); out = silu(conv2(h)+reslink)
                K, pad, has_proj = blk['K'], blk['pad'], blk['has_proj']
                a_ref, b1_ref, bias1_ref, b2_ref, bias2_ref = prefs[idx:idx + 5]
                idx += 5
                if has_proj:
                    bp_ref, biasp_ref = prefs[idx:idx + 2]
                    idx += 2
                xb = x.astype(jnp.bfloat16)

                def conv_same(inp_b, w_ref, bias_ref, a_ref=a_ref, K=K, pad=pad):
                    acc = None
                    for kh in range(K):
                        if kh == pad:             # centre tap: A[kh] == identity
                            shifted = inp_b
                        else:                     # row shift as a tiny MXU matmul
                            shifted = jnp.dot(a_ref[kh], inp_b,
                                              preferred_element_type=jnp.float32
                                              ).astype(jnp.bfloat16)
                        part = jnp.dot(shifted, w_ref[kh],
                                       preferred_element_type=jnp.float32)
                        acc = part if acc is None else acc + part
                    return acc + bias_ref[...]    # BN bias (scale folded into weights)

                h = _silu(conv_same(xb, b1_ref, bias1_ref))
                y = conv_same(h.astype(jnp.bfloat16), b2_ref, bias2_ref)
                if has_proj:                      # 1x1 projection of the residual
                    res = jnp.dot(xb, bp_ref[...],
                                  preferred_element_type=jnp.float32) + biasp_ref[...]
                else:                             # identity residual (Cin == Cout)
                    res = x
                x = _silu(y + res)
        o_ref[0] = x.astype(o_ref.dtype)

    return kernel


# ----------------------------------------------------------------------------
# Wrapper-side weight packing (pure linear algebra on parameters, done once).
# ----------------------------------------------------------------------------
def _pack_conv(w, scale, bias, H, W, stride):
    """Pack a KxK conv + folded-BN affine into the lane-mixing form.

    Returns
      A: (K, Hout, H)          bf16 0/1 row-shift / row-subsample matrices
      B: (K, W*Cin, Wout*Cout) bf16 weights with kw-shift, W-subsample and BN scale
      b: (1, Wout*Cout)        f32 lane-tiled BN bias
    so that for X[h, w*Cin + c] = x[h, w, c]:
      conv_out[oh, wo*Cout + o] = (sum_kh A[kh] @ X @ B[kh])[oh, wo*Cout + o] + b
    matching PyTorch Conv2d(pad=(K-1)//2) + BatchNorm (running stats).
    """
    K, _, Cin, Cout = w.shape
    pad = (K - 1) // 2
    Hout = (H + 2 * pad - K) // stride + 1
    Wout = (W + 2 * pad - K) // stride + 1
    wf = w.astype(jnp.float32) * scale.astype(jnp.float32)[None, None, None, :]

    wi = jnp.arange(W)
    wo = jnp.arange(Wout)
    B = jnp.zeros((K, W * Cin, Wout * Cout), jnp.float32)
    for kh in range(K):
        Bk = jnp.zeros((W * Cin, Wout * Cout), jnp.float32)
        for kw in range(K):
            sel = (wi[:, None] == stride * wo[None, :] + (kw - pad)).astype(jnp.float32)
            Bk = Bk + jnp.einsum('wv,co->wcvo', sel, wf[kh, kw]).reshape(
                W * Cin, Wout * Cout)
        B = B.at[kh].set(Bk)

    hi = jnp.arange(H)
    ho = jnp.arange(Hout)
    A = jnp.stack(
        [(hi[None, :] == stride * ho[:, None] + (kh - pad)).astype(jnp.float32)
         for kh in range(K)], axis=0)

    b_lane = jnp.tile(bias.astype(jnp.float32), Wout)[None, :]
    return A.astype(jnp.bfloat16), B.astype(jnp.bfloat16), b_lane


# ----------------------------------------------------------------------------
# Whole-stage forward: builds the static plan + packed params, ONE pallas_call.
# ----------------------------------------------------------------------------
def super_res_conv_kxkx_forward(x_nchw, blocks_params):
    """SuperResConvKXKX forward (eval mode, act='silu', with_spp=False)."""
    N, C, H, W = x_nchw.shape
    x = jnp.transpose(x_nchw, (0, 2, 3, 1)).reshape(N, H, W * C)  # NCHW -> (N,H,W*C)

    plan, args, in_specs = [], [], [pl.BlockSpec((1, H, W * C), lambda n: (n, 0, 0))]
    curH, curW, curC = H, W, C

    for blk in blocks_params:
        if blk['stride'] == 2:
            w, s, b = blk['down']
            K = w.shape[0]
            Cout = w.shape[-1]
            A, B, bias = _pack_conv(w, s, b, curH, curW, 2)
            Ho = A.shape[1]
            Wo = bias.shape[1] // Cout
            plan.append({'type': 'down', 'K': K})
            args += [A, B, bias]
            in_specs += [
                pl.BlockSpec(A.shape, lambda n: (0, 0, 0)),
                pl.BlockSpec(B.shape, lambda n: (0, 0, 0)),
                pl.BlockSpec(bias.shape, lambda n: (0, 0)),
            ]
            curH, curW, curC = Ho, Wo, Cout
        else:
            w1, s1, b1 = blk['conv1']
            w2, s2, b2 = blk['conv2']
            K = w1.shape[0]
            pad = (K - 1) // 2
            Cout = w2.shape[-1]
            has_proj = blk['proj'] is not None
            assert has_proj or curC == Cout
            A, B1, bias1 = _pack_conv(w1, s1, b1, curH, curW, 1)
            _, B2, bias2 = _pack_conv(w2, s2, b2, curH, curW, 1)
            plan.append({'type': 'res', 'K': K, 'pad': pad, 'has_proj': has_proj})
            args += [A, B1, bias1, B2, bias2]
            in_specs += [
                pl.BlockSpec(A.shape, lambda n: (0, 0, 0)),
                pl.BlockSpec(B1.shape, lambda n: (0, 0, 0)),
                pl.BlockSpec(bias1.shape, lambda n: (0, 0)),
                pl.BlockSpec(B2.shape, lambda n: (0, 0, 0)),
                pl.BlockSpec(bias2.shape, lambda n: (0, 0)),
            ]
            if has_proj:
                wp, sp, bpv = blk['proj']
                _, Bp, biasp = _pack_conv(wp, sp, bpv, curH, curW, 1)
                args += [Bp[0], biasp]
                in_specs += [
                    pl.BlockSpec(Bp[0].shape, lambda n: (0, 0)),
                    pl.BlockSpec(biasp.shape, lambda n: (0, 0)),
                ]
            curC = Cout

    y = pl.pallas_call(
        _make_fused_kernel(plan),
        out_shape=jax.ShapeDtypeStruct((N, curH, curW * curC), jnp.float32),
        grid=(N,),
        in_specs=in_specs,
        out_specs=pl.BlockSpec((1, curH, curW * curC), lambda n: (n, 0, 0)),
        compiler_params=pltpu.CompilerParams(
            dimension_semantics=("parallel",),
            vmem_limit_bytes=_VMEM_LIMIT_BYTES),
    )(x, *args)
    return jnp.transpose(y.reshape(N, curH, curW, curC), (0, 3, 1, 2))     # -> NCHW


# ----------------------------------------------------------------------------
# Deterministic synthetic parameters (ConvKXBN = conv(no bias) + BatchNorm,
# BN running stats folded to per-channel affine).
# ----------------------------------------------------------------------------
def make_convbn_params(key, in_c, out_c, k):
    kw_, kg, kb, km, kv = jax.random.split(key, 5)
    w = 0.1 * jax.random.normal(kw_, (k, k, in_c, out_c), jnp.float32)
    w = w.astype(jnp.bfloat16).astype(jnp.float32)  # bf16-quantized weights (shared with ref)
    gamma = 1.0 + 0.1 * jax.random.normal(kg, (out_c,), jnp.float32)
    beta = 0.1 * jax.random.normal(kb, (out_c,), jnp.float32)
    mean = 0.1 * jax.random.normal(km, (out_c,), jnp.float32)
    var = jnp.abs(jax.random.normal(kv, (out_c,), jnp.float32)) + 0.5
    scale = gamma / jnp.sqrt(var + 1e-5)
    bias = beta - mean * scale
    return w, scale, bias


def fold_repvgg(w_kxk, s1, b1, w_1x1, s2, b2, k):
    """Fold BN(conv_kxk) + BN(conv_1x1) (identity activation) into one KxK conv."""
    w_eff = w_kxk * s1[None, None, None, :]
    w1 = w_1x1[0, 0] * s2[None, :]
    c = (k - 1) // 2
    w_eff = w_eff.at[c, c].add(w1)
    return w_eff, jnp.ones_like(b1), b1 + b2


def build_super_res_params(key, in_c, out_c, btn_c, kernel_size, stride, num_blocks):
    blocks = []
    for block_id in range(num_blocks):
        ic = in_c if block_id == 0 else out_c
        st = stride if block_id == 0 else 1
        key, k1, k2, k3, k4 = jax.random.split(key, 5)
        if st == 2:
            blocks.append({'stride': 2,
                           'down': make_convbn_params(k1, ic, out_c, 3)})
        else:
            conv1 = make_convbn_params(k1, ic, btn_c, kernel_size)
            wa, sa, ba = make_convbn_params(k2, btn_c, out_c, kernel_size)
            wb, sb, bb = make_convbn_params(k3, btn_c, out_c, 1)
            conv2 = fold_repvgg(wa, sa, ba, wb, sb, bb, kernel_size)
            proj = (make_convbn_params(k4, ic, out_c, 1) if ic != out_c else None)
            blocks.append({'stride': 1, 'conv1': conv1, 'conv2': conv2,
                           'proj': proj})
    return blocks


# ----------------------------------------------------------------------------
# Pure-JAX reference (f32, XLA conv) for correctness checking.
# ----------------------------------------------------------------------------
def _ref_convbn(x_nhwc, w, scale, bias, stride):
    p = (w.shape[0] - 1) // 2
    y = lax.conv_general_dilated(
        x_nhwc, w, (stride, stride), ((p, p), (p, p)),
        dimension_numbers=('NHWC', 'HWIO', 'NHWC'),
        precision=lax.Precision.HIGHEST)
    return y * scale + bias


def _ref_silu(y):
    return y * jax.nn.sigmoid(y)


def reference_forward(x_nchw, blocks_params):
    x = jnp.transpose(x_nchw, (0, 2, 3, 1))
    for blk in blocks_params:
        if blk['stride'] == 2:
            w, s, b = blk['down']
            x = _ref_silu(_ref_convbn(x, w, s, b, 2))
            continue
        res = x if blk['proj'] is None else _ref_convbn(x, *blk['proj'], 1)
        w1, s1, b1 = blk['conv1']
        h = _ref_silu(_ref_convbn(x, w1, s1, b1, 1))
        w2, s2, b2 = blk['conv2']
        x = _ref_silu(_ref_convbn(h, w2, s2, b2, 1) + res)
    return jnp.transpose(x, (0, 3, 1, 2))


if __name__ == "__main__":
    key = jax.random.PRNGKey(0)
    in_c, out_c, btn_c, kernel_size = 4, 8, 4, 3

    key, kparams, kx = jax.random.split(key, 3)
    x = jax.random.normal(kx, (2, in_c, 16, 16), jnp.float32)  # NCHW input

    # Stride-1 stage: two residual blocks (first has a 1x1 residual projection).
    params_s1 = build_super_res_params(kparams, in_c, out_c, btn_c,
                                       kernel_size, stride=1, num_blocks=2)
    out1 = jax.block_until_ready(super_res_conv_kxkx_forward(x, params_s1))
    ref1 = reference_forward(x, params_s1)
    assert out1.shape == (2, out_c, 16, 16), out1.shape
    assert jnp.all(jnp.isfinite(out1))
    assert jnp.allclose(out1, ref1, atol=5e-2, rtol=5e-2)

    # Stride-2 stage: downsampler block + one residual block (exercises that path).
    key, kparams2 = jax.random.split(key)
    params_s2 = build_super_res_params(kparams2, in_c, out_c, btn_c,
                                       kernel_size, stride=2, num_blocks=2)
    out2 = jax.block_until_ready(super_res_conv_kxkx_forward(x, params_s2))
    ref2 = reference_forward(x, params_s2)
    assert out2.shape == (2, out_c, 8, 8), out2.shape
    assert jnp.all(jnp.isfinite(out2))
    assert jnp.allclose(out2, ref2, atol=5e-2, rtol=5e-2)

    print("KERNEL_OK")
</pallas_src>

<mosaic_0001>
module attributes {stable_mosaic.version = 11 : i64} {
  func.func @kernel(%arg0: i32, %arg1: memref<1x16x64xf32, #tpu.memory_space<vmem>>, %arg2: memref<3x16x16xbf16, #tpu.memory_space<vmem>>, %arg3: memref<3x64x64xbf16, #tpu.memory_space<vmem>>, %arg4: memref<1x64xf32, #tpu.memory_space<vmem>>, %arg5: memref<3x64x128xbf16, #tpu.memory_space<vmem>>, %arg6: memref<1x128xf32, #tpu.memory_space<vmem>>, %arg7: memref<64x128xbf16, #tpu.memory_space<vmem>>, %arg8: memref<1x128xf32, #tpu.memory_space<vmem>>, %arg9: memref<3x16x16xbf16, #tpu.memory_space<vmem>>, %arg10: memref<3x128x64xbf16, #tpu.memory_space<vmem>>, %arg11: memref<1x64xf32, #tpu.memory_space<vmem>>, %arg12: memref<3x64x128xbf16, #tpu.memory_space<vmem>>, %arg13: memref<1x128xf32, #tpu.memory_space<vmem>>, %arg14: memref<1x16x128xf32, #tpu.memory_space<vmem>>) attributes {dimension_semantics = [#tpu.dimension_semantics<parallel>], iteration_bounds = array<i64: 2>, scalar_prefetch = 0 : i64, scratch_operands = 0 : i64, tpu.core_type = #tpu.core_type<tc>, window_params = [{transform_indices = @transform_0, window_bounds = array<i64: 1, 16, 64>}, {pipeline_mode = #tpu.pipeline_mode<synchronous>, transform_indices = @transform_1, window_bounds = array<i64: 3, 16, 16>}, {pipeline_mode = #tpu.pipeline_mode<synchronous>, transform_indices = @transform_2, window_bounds = array<i64: 3, 64, 64>}, {pipeline_mode = #tpu.pipeline_mode<synchronous>, transform_indices = @transform_3, window_bounds = array<i64: 1, 64>}, {pipeline_mode = #tpu.pipeline_mode<synchronous>, transform_indices = @transform_4, window_bounds = array<i64: 3, 64, 128>}, {pipeline_mode = #tpu.pipeline_mode<synchronous>, transform_indices = @transform_5, window_bounds = array<i64: 1, 128>}, {pipeline_mode = #tpu.pipeline_mode<synchronous>, transform_indices = @transform_6, window_bounds = array<i64: 64, 128>}, {pipeline_mode = #tpu.pipeline_mode<synchronous>, transform_indices = @transform_7, window_bounds = array<i64: 1, 128>}, {pipeline_mode = #tpu.pipeline_mode<synchronous>, transform_indices = @transform_8, window_bounds = array<i64: 3, 16, 16>}, {pipeline_mode = #tpu.pipeline_mode<synchronous>, transform_indices = @transform_9, window_bounds = array<i64: 3, 128, 64>}, {pipeline_mode = #tpu.pipeline_mode<synchronous>, transform_indices = @transform_10, window_bounds = array<i64: 1, 64>}, {pipeline_mode = #tpu.pipeline_mode<synchronous>, transform_indices = @transform_11, window_bounds = array<i64: 3, 64, 128>}, {pipeline_mode = #tpu.pipeline_mode<synchronous>, transform_indices = @transform_12, window_bounds = array<i64: 1, 128>}, {transform_indices = @transform_13, window_bounds = array<i64: 1, 16, 128>}]} {
    %c0 = arith.constant 0 : index
    %c0_0 = arith.constant 0 : index
    %c0_1 = arith.constant 0 : index
    %0 = vector.load %arg1[%c0, %c0_0, %c0_1] : memref<1x16x64xf32, #tpu.memory_space<vmem>>, vector<1x16x64xf32>
    %1 = vector.shape_cast %0 : vector<1x16x64xf32> to vector<16x64xf32>
    %2 = arith.truncf %1 : vector<16x64xf32> to vector<16x64xbf16>
    %c0_2 = arith.constant 0 : index
    %c0_3 = arith.constant 0 : index
    %c0_4 = arith.constant 0 : index
    %3 = vector.load %arg2[%c0_2, %c0_3, %c0_4] : memref<3x16x16xbf16, #tpu.memory_space<vmem>>, vector<1x16x16xbf16>
    %4 = vector.shape_cast %3 : vector<1x16x16xbf16> to vector<16x16xbf16>
    %cst = arith.constant dense<0.000000e+00> : vector<16x64xf32>
    %5 = tpu.matmul %4, %2, %cst {dimension_numbers = #tpu.dot_dimension_numbers<[1], [0], [0], [1], [0, 0, 1, 1], [], []>} : vector<16x16xbf16>, vector<16x64xbf16>, vector<16x64xf32> -> vector<16x64xf32>
    %6 = arith.truncf %5 : vector<16x64xf32> to vector<16x64xbf16>
    %c0_5 = arith.constant 0 : index
    %c0_6 = arith.constant 0 : index
    %c0_7 = arith.constant 0 : index
    %7 = vector.load %arg3[%c0_5, %c0_6, %c0_7] : memref<3x64x64xbf16, #tpu.memory_space<vmem>>, vector<1x64x64xbf16>
    %8 = vector.shape_cast %7 : vector<1x64x64xbf16> to vector<64x64xbf16>
    %cst_8 = arith.constant dense<0.000000e+00> : vector<16x64xf32>
    %9 = tpu.matmul %6, %8, %cst_8 {dimension_numbers = #tpu.dot_dimension_numbers<[1], [0], [0], [1], [0, 0, 1, 1], [], []>} : vector<16x64xbf16>, vector<64x64xbf16>, vector<16x64xf32> -> vector<16x64xf32>
    %c1 = arith.constant 1 : index
    %c0_9 = arith.constant 0 : index
    %c0_10 = arith.constant 0 : index
    %10 = vector.load %arg3[%c1, %c0_9, %c0_10] : memref<3x64x64xbf16, #tpu.memory_space<vmem>>, vector<1x64x64xbf16>
    %11 = vector.shape_cast %10 : vector<1x64x64xbf16> to vector<64x64xbf16>
    %cst_11 = arith.constant dense<0.000000e+00> : vector<16x64xf32>
    %12 = tpu.matmul %2, %11, %cst_11 {dimension_numbers = #tpu.dot_dimension_numbers<[1], [0], [0], [1], [0, 0, 1, 1], [], []>} : vector<16x64xbf16>, vector<64x64xbf16>, vector<16x64xf32> -> vector<16x64xf32>
    %13 = arith.addf %9, %12 : vector<16x64xf32>
    %c2 = arith.constant 2 : index
    %c0_12 = arith.constant 0 : index
    %c0_13 = arith.constant 0 : index
    %14 = vector.load %arg2[%c2, %c0_12, %c0_13] : memref<3x16x16xbf16, #tpu.memory_space<vmem>>, vector<1x16x16xbf16>
    %15 = vector.shape_cast %14 : vector<1x16x16xbf16> to vector<16x16xbf16>
    %cst_14 = arith.constant dense<0.000000e+00> : vector<16x64xf32>
    %16 = tpu.matmul %15, %2, %cst_14 {dimension_numbers = #tpu.dot_dimension_numbers<[1], [0], [0], [1], [0, 0, 1, 1], [], []>} : vector<16x16xbf16>, vector<16x64xbf16>, vector<16x64xf32> -> vector<16x64xf32>
    %17 = arith.truncf %16 : vector<16x64xf32> to vector<16x64xbf16>
    %c2_15 = arith.constant 2 : index
    %c0_16 = arith.constant 0 : index
    %c0_17 = arith.constant 0 : index
    %18 = vector.load %arg3[%c2_15, %c0_16, %c0_17] : memref<3x64x64xbf16, #tpu.memory_space<vmem>>, vector<1x64x64xbf16>
    %19 = vector.shape_cast %18 : vector<1x64x64xbf16> to vector<64x64xbf16>
    %cst_18 = arith.constant dense<0.000000e+00> : vector<16x64xf32>
    %20 = tpu.matmul %17, %19, %cst_18 {dimension_numbers = #tpu.dot_dimension_numbers<[1], [0], [0], [1], [0, 0, 1, 1], [], []>} : vector<16x64xbf16>, vector<64x64xbf16>, vector<16x64xf32> -> vector<16x64xf32>
    %21 = arith.addf %13, %20 : vector<16x64xf32>
    %c0_19 = arith.constant 0 : index
    %c0_20 = arith.constant 0 : index
    %22 = vector.load %arg4[%c0_19, %c0_20] : memref<1x64xf32, #tpu.memory_space<vmem>>, vector<1x64xf32>
    %23 = vector.broadcast %22 : vector<1x64xf32> to vector<16x64xf32>
    %24 = arith.addf %21, %23 : vector<16x64xf32>
    %cst_21 = arith.constant 0.000000e+00 : f32
    %25 = vector.broadcast %cst_21 : f32 to vector<16x64xf32>
    %26 = arith.subf %25, %24 : vector<16x64xf32>
    %27 = math.exp %26 : vector<16x64xf32>
    %cst_22 = arith.constant 1.000000e+00 : f32
    %28 = vector.broadcast %cst_22 : f32 to vector<16x64xf32>
    %29 = arith.addf %28, %27 : vector<16x64xf32>
    %30 = tpu.reciprocal %29 {approx = true} : vector<16x64xf32> -> vector<16x64xf32>
    %31 = arith.mulf %24, %30 : vector<16x64xf32>
    %32 = arith.truncf %31 : vector<16x64xf32> to vector<16x64xbf16>
    %c0_23 = arith.constant 0 : index
    %c0_24 = arith.constant 0 : index
    %c0_25 = arith.constant 0 : index
    %33 = vector.load %arg2[%c0_23, %c0_24, %c0_25] : memref<3x16x16xbf16, #tpu.memory_space<vmem>>, vector<1x16x16xbf16>
    %34 = vector.shape_cast %33 : vector<1x16x16xbf16> to vector<16x16xbf16>
    %cst_26 = arith.constant dense<0.000000e+00> : vector<16x64xf32>
    %35 = tpu.matmul %34, %32, %cst_26 {dimension_numbers = #tpu.dot_dimension_numbers<[1], [0], [0], [1], [0, 0, 1, 1], [], []>} : vector<16x16xbf16>, vector<16x64xbf16>, vector<16x64xf32> -> vector<16x64xf32>
    %36 = arith.truncf %35 : vector<16x64xf32> to vector<16x64xbf16>
    %c0_27 = arith.constant 0 : index
    %c0_28 = arith.constant 0 : index
    %c0_29 = arith.constant 0 : index
    %37 = vector.load %arg5[%c0_27, %c0_28, %c0_29] : memref<3x64x128xbf16, #tpu.memory_space<vmem>>, vector<1x64x128xbf16>
    %38 = vector.shape_cast %37 : vector<1x64x128xbf16> to vector<64x128xbf16>
    %cst_30 = arith.constant dense<0.000000e+00> : vector<16x128xf32>
    %39 = tpu.matmul %36, %38, %cst_30 {dimension_numbers = #tpu.dot_dimension_numbers<[1], [0], [0], [1], [0, 0, 1, 1], [], []>} : vector<16x64xbf16>, vector<64x128xbf16>, vector<16x128xf32> -> vector<16x128xf32>
    %c1_31 = arith.constant 1 : index
    %c0_32 = arith.constant 0 : index
    %c0_33 = arith.constant 0 : index
    %40 = vector.load %arg5[%c1_31, %c0_32, %c0_33] : memref<3x64x128xbf16, #tpu.memory_space<vmem>>, vector<1x64x128xbf16>
    %41 = vector.shape_cast %40 : vector<1x64x128xbf16> to vector<64x128xbf16>
    %cst_34 = arith.constant dense<0.000000e+00> : vector<16x128xf32>
    %42 = tpu.matmul %32, %41, %cst_34 {dimension_numbers = #tpu.dot_dimension_numbers<[1], [0], [0], [1], [0, 0, 1, 1], [], []>} : vector<16x64xbf16>, vector<64x128xbf16>, vector<16x128xf32> -> vector<16x128xf32>
    %43 = arith.addf %39, %42 : vector<16x128xf32>
    %c2_35 = arith.constant 2 : index
    %c0_36 = arith.constant 0 : index
    %c0_37 = arith.constant 0 : index
    %44 = vector.load %arg2[%c2_35, %c0_36, %c0_37] : memref<3x16x16xbf16, #tpu.memory_space<vmem>>, vector<1x16x16xbf16>
    %45 = vector.shape_cast %44 : vector<1x16x16xbf16> to vector<16x16xbf16>
    %cst_38 = arith.constant dense<0.000000e+00> : vector<16x64xf32>
    %46 = tpu.matmul %45, %32, %cst_38 {dimension_numbers = #tpu.dot_dimension_numbers<[1], [0], [0], [1], [0, 0, 1, 1], [], []>} : vector<16x16xbf16>, vector<16x64xbf16>, vector<16x64xf32> -> vector<16x64xf32>
    %47 = arith.truncf %46 : vector<16x64xf32> to vector<16x64xbf16>
    %c2_39 = arith.constant 2 : index
    %c0_40 = arith.constant 0 : index
    %c0_41 = arith.constant 0 : index
    %48 = vector.load %arg5[%c2_39, %c0_40, %c0_41] : memref<3x64x128xbf16, #tpu.memory_space<vmem>>, vector<1x64x128xbf16>
    %49 = vector.shape_cast %48 : vector<1x64x128xbf16> to vector<64x128xbf16>
    %cst_42 = arith.constant dense<0.000000e+00> : vector<16x128xf32>
    %50 = tpu.matmul %47, %49, %cst_42 {dimension_numbers = #tpu.dot_dimension_numbers<[1], [0], [0], [1], [0, 0, 1, 1], [], []>} : vector<16x64xbf16>, vector<64x128xbf16>, vector<16x128xf32> -> vector<16x128xf32>
    %51 = arith.addf %43, %50 : vector<16x128xf32>
    %c0_43 = arith.constant 0 : index
    %c0_44 = arith.constant 0 : index
    %52 = vector.load %arg6[%c0_43, %c0_44] : memref<1x128xf32, #tpu.memory_space<vmem>>, vector<1x128xf32>
    %53 = vector.broadcast %52 : vector<1x128xf32> to vector<16x128xf32>
    %54 = arith.addf %51, %53 : vector<16x128xf32>
    %c0_45 = arith.constant 0 : index
    %c0_46 = arith.constant 0 : index
    %55 = vector.load %arg7[%c0_45, %c0_46] : memref<64x128xbf16, #tpu.memory_space<vmem>>, vector<64x128xbf16>
    %cst_47 = arith.constant dense<0.000000e+00> : vector<16x128xf32>
    %56 = tpu.matmul %2, %55, %cst_47 {dimension_numbers = #tpu.dot_dimension_numbers<[1], [0], [0], [1], [0, 0, 1, 1], [], []>} : vector<16x64xbf16>, vector<64x128xbf16>, vector<16x128xf32> -> vector<16x128xf32>
    %c0_48 = arith.constant 0 : index
    %c0_49 = arith.constant 0 : index
    %57 = vector.load %arg8[%c0_48, %c0_49] : memref<1x128xf32, #tpu.memory_space<vmem>>, vector<1x128xf32>
    %58 = vector.broadcast %57 : vector<1x128xf32> to vector<16x128xf32>
    %59 = arith.addf %56, %58 : vector<16x128xf32>
    %60 = arith.addf %54, %59 : vector<16x128xf32>
    %cst_50 = arith.constant 0.000000e+00 : f32
    %61 = vector.broadcast %cst_50 : f32 to vector<16x128xf32>
    %62 = arith.subf %61, %60 : vector<16x128xf32>
    %63 = math.exp %62 : vector<16x128xf32>
    %cst_51 = arith.constant 1.000000e+00 : f32
    %64 = vector.broadcast %cst_51 : f32 to vector<16x128xf32>
    %65 = arith.addf %64, %63 : vector<16x128xf32>
    %66 = tpu.reciprocal %65 {approx = true} : vector<16x128xf32> -> vector<16x128xf32>
    %67 = arith.mulf %60, %66 : vector<16x128xf32>
    %68 = arith.truncf %67 : vector<16x128xf32> to vector<16x128xbf16>
    %c0_52 = arith.constant 0 : index
    %c0_53 = arith.constant 0 : index
    %c0_54 = arith.constant 0 : index
    %69 = vector.load %arg9[%c0_52, %c0_53, %c0_54] : memref<3x16x16xbf16, #tpu.memory_space<vmem>>, vector<1x16x16xbf16>
    %70 = vector.shape_cast %69 : vector<1x16x16xbf16> to vector<16x16xbf16>
    %cst_55 = arith.constant dense<0.000000e+00> : vector<16x128xf32>
    %71 = tpu.matmul %70, %68, %cst_55 {dimension_numbers = #tpu.dot_dimension_numbers<[1], [0], [0], [1], [0, 0, 1, 1], [], []>} : vector<16x16xbf16>, vector<16x128xbf16>, vector<16x128xf32> -> vector<16x128xf32>
    %72 = arith.truncf %71 : vector<16x128xf32> to vector<16x128xbf16>
    %c0_56 = arith.constant 0 : index
    %c0_57 = arith.constant 0 : index
    %c0_58 = arith.constant 0 : index
    %73 = vector.load %arg10[%c0_56, %c0_57, %c0_58] : memref<3x128x64xbf16, #tpu.memory_space<vmem>>, vector<1x128x64xbf16>
    %74 = vector.shape_cast %73 : vector<1x128x64xbf16> to vector<128x64xbf16>
    %cst_59 = arith.constant dense<0.000000e+00> : vector<16x64xf32>
    %75 = tpu.matmul %72, %74, %cst_59 {dimension_numbers = #tpu.dot_dimension_numbers<[1], [0], [0], [1], [0, 0, 1, 1], [], []>} : vector<16x128xbf16>, vector<128x64xbf16>, vector<16x64xf32> -> vector<16x64xf32>
    %c1_60 = arith.constant 1 : index
    %c0_61 = arith.constant 0 : index
    %c0_62 = arith.constant 0 : index
    %76 = vector.load %arg10[%c1_60, %c0_61, %c0_62] : memref<3x128x64xbf16, #tpu.memory_space<vmem>>, vector<1x128x64xbf16>
    %77 = vector.shape_cast %76 : vector<1x128x64xbf16> to vector<128x64xbf16>
    %cst_63 = arith.constant dense<0.000000e+00> : vector<16x64xf32>
    %78 = tpu.matmul %68, %77, %cst_63 {dimension_numbers = #tpu.dot_dimension_numbers<[1], [0], [0], [1], [0, 0, 1, 1], [], []>} : vector<16x128xbf16>, vector<128x64xbf16>, vector<16x64xf32> -> vector<16x64xf32>
    %79 = arith.addf %75, %78 : vector<16x64xf32>
    %c2_64 = arith.constant 2 : index
    %c0_65 = arith.constant 0 : index
    %c0_66 = arith.constant 0 : index
    %80 = vector.load %arg9[%c2_64, %c0_65, %c0_66] : memref<3x16x16xbf16, #tpu.memory_space<vmem>>, vector<1x16x16xbf16>
    %81 = vector.shape_cast %80 : vector<1x16x16xbf16> to vector<16x16xbf16>
    %cst_67 = arith.constant dense<0.000000e+00> : vector<16x128xf32>
    %82 = tpu.matmul %81, %68, %cst_67 {dimension_numbers = #tpu.dot_dimension_numbers<[1], [0], [0], [1], [0, 0, 1, 1], [], []>} : vector<16x16xbf16>, vector<16x128xbf16>, vector<16x128xf32> -> vector<16x128xf32>
    %83 = arith.truncf %82 : vector<16x128xf32> to vector<16x128xbf16>
    %c2_68 = arith.constant 2 : index
    %c0_69 = arith.constant 0 : index
    %c0_70 = arith.constant 0 : index
    %84 = vector.load %arg10[%c2_68, %c0_69, %c0_70] : memref<3x128x64xbf16, #tpu.memory_space<vmem>>, vector<1x128x64xbf16>
    %85 = vector.shape_cast %84 : vector<1x128x64xbf16> to vector<128x64xbf16>
    %cst_71 = arith.constant dense<0.000000e+00> : vector<16x64xf32>
    %86 = tpu.matmul %83, %85, %cst_71 {dimension_numbers = #tpu.dot_dimension_numbers<[1], [0], [0], [1], [0, 0, 1, 1], [], []>} : vector<16x128xbf16>, vector<128x64xbf16>, vector<16x64xf32> -> vector<16x64xf32>
    %87 = arith.addf %79, %86 : vector<16x64xf32>
    %c0_72 = arith.constant 0 : index
    %c0_73 = arith.constant 0 : index
    %88 = vector.load %arg11[%c0_72, %c0_73] : memref<1x64xf32, #tpu.memory_space<vmem>>, vector<1x64xf32>
    %89 = vector.broadcast %88 : vector<1x64xf32> to vector<16x64xf32>
    %90 = arith.addf %87, %89 : vector<16x64xf32>
    %cst_74 = arith.constant 0.000000e+00 : f32
    %91 = vector.broadcast %cst_74 : f32 to vector<16x64xf32>
    %92 = arith.subf %91, %90 : vector<16x64xf32>
    %93 = math.exp %92 : vector<16x64xf32>
    %cst_75 = arith.constant 1.000000e+00 : f32
    %94 = vector.broadcast %cst_75 : f32 to vector<16x64xf32>
    %95 = arith.addf %94, %93 : vector<16x64xf32>
    %96 = tpu.reciprocal %95 {approx = true} : vector<16x64xf32> -> vector<16x64xf32>
    %97 = arith.mulf %90, %96 : vector<16x64xf32>
    %98 = arith.truncf %97 : vector<16x64xf32> to vector<16x64xbf16>
    %c0_76 = arith.constant 0 : index
    %c0_77 = arith.constant 0 : index
    %c0_78 = arith.constant 0 : index
    %99 = vector.load %arg9[%c0_76, %c0_77, %c0_78] : memref<3x16x16xbf16, #tpu.memory_space<vmem>>, vector<1x16x16xbf16>
    %100 = vector.shape_cast %99 : vector<1x16x16xbf16> to vector<16x16xbf16>
    %cst_79 = arith.constant dense<0.000000e+00> : vector<16x64xf32>
    %101 = tpu.matmul %100, %98, %cst_79 {dimension_numbers = #tpu.dot_dimension_numbers<[1], [0], [0], [1], [0, 0, 1, 1], [], []>} : vector<16x16xbf16>, vector<16x64xbf16>, vector<16x64xf32> -> vector<16x64xf32>
    %102 = arith.truncf %101 : vector<16x64xf32> to vector<16x64xbf16>
    %c0_80 = arith.constant 0 : index
    %c0_81 = arith.constant 0 : index
    %c0_82 = arith.constant 0 : index
    %103 = vector.load %arg12[%c0_80, %c0_81, %c0_82] : memref<3x64x128xbf16, #tpu.memory_space<vmem>>, vector<1x64x128xbf16>
    %104 = vector.shape_cast %103 : vector<1x64x128xbf16> to vector<64x128xbf16>
    %cst_83 = arith.constant dense<0.000000e+00> : vector<16x128xf32>
    %105 = tpu.matmul %102, %104, %cst_83 {dimension_numbers = #tpu.dot_dimension_numbers<[1], [0], [0], [1], [0, 0, 1, 1], [], []>} : vector<16x64xbf16>, vector<64x128xbf16>, vector<16x128xf32> -> vector<16x128xf32>
    %c1_84 = arith.constant 1 : index
    %c0_85 = arith.constant 0 : index
    %c0_86 = arith.constant 0 : index
    %106 = vector.load %arg12[%c1_84, %c0_85, %c0_86] : memref<3x64x128xbf16, #tpu.memory_space<vmem>>, vector<1x64x128xbf16>
    %107 = vector.shape_cast %106 : vector<1x64x128xbf16> to vector<64x128xbf16>
    %cst_87 = arith.constant dense<0.000000e+00> : vector<16x128xf32>
    %108 = tpu.matmul %98, %107, %cst_87 {dimension_numbers = #tpu.dot_dimension_numbers<[1], [0], [0], [1], [0, 0, 1, 1], [], []>} : vector<16x64xbf16>, vector<64x128xbf16>, vector<16x128xf32> -> vector<16x128xf32>
    %109 = arith.addf %105, %108 : vector<16x128xf32>
    %c2_88 = arith.constant 2 : index
    %c0_89 = arith.constant 0 : index
    %c0_90 = arith.constant 0 : index
    %110 = vector.load %arg9[%c2_88, %c0_89, %c0_90] : memref<3x16x16xbf16, #tpu.memory_space<vmem>>, vector<1x16x16xbf16>
    %111 = vector.shape_cast %110 : vector<1x16x16xbf16> to vector<16x16xbf16>
    %cst_91 = arith.constant dense<0.000000e+00> : vector<16x64xf32>
    %112 = tpu.matmul %111, %98, %cst_91 {dimension_numbers = #tpu.dot_dimension_numbers<[1], [0], [0], [1], [0, 0, 1, 1], [], []>} : vector<16x16xbf16>, vector<16x64xbf16>, vector<16x64xf32> -> vector<16x64xf32>
    %113 = arith.truncf %112 : vector<16x64xf32> to vector<16x64xbf16>
    %c2_92 = arith.constant 2 : index
    %c0_93 = arith.constant 0 : index
    %c0_94 = arith.constant 0 : index
    %114 = vector.load %arg12[%c2_92, %c0_93, %c0_94] : memref<3x64x128xbf16, #tpu.memory_space<vmem>>, vector<1x64x128xbf16>
    %115 = vector.shape_cast %114 : vector<1x64x128xbf16> to vector<64x128xbf16>
    %cst_95 = arith.constant dense<0.000000e+00> : vector<16x128xf32>
    %116 = tpu.matmul %113, %115, %cst_95 {dimension_numbers = #tpu.dot_dimension_numbers<[1], [0], [0], [1], [0, 0, 1, 1], [], []>} : vector<16x64xbf16>, vector<64x128xbf16>, vector<16x128xf32> -> vector<16x128xf32>
    %117 = arith.addf %109, %116 : vector<16x128xf32>
    %c0_96 = arith.constant 0 : index
    %c0_97 = arith.constant 0 : index
    %118 = vector.load %arg13[%c0_96, %c0_97] : memref<1x128xf32, #tpu.memory_space<vmem>>, vector<1x128xf32>
    %119 = vector.broadcast %118 : vector<1x128xf32> to vector<16x128xf32>
    %120 = arith.addf %117, %119 : vector<16x128xf32>
    %121 = arith.addf %120, %67 : vector<16x128xf32>
    %cst_98 = arith.constant 0.000000e+00 : f32
    %122 = vector.broadcast %cst_98 : f32 to vector<16x128xf32>
    %123 = arith.subf %122, %121 : vector<16x128xf32>
    %124 = math.exp %123 : vector<16x128xf32>
    %cst_99 = arith.constant 1.000000e+00 : f32
    %125 = vector.broadcast %cst_99 : f32 to vector<16x128xf32>
    %126 = arith.addf %125, %124 : vector<16x128xf32>
    %127 = tpu.reciprocal %126 {approx = true} : vector<16x128xf32> -> vector<16x128xf32>
    %128 = arith.mulf %121, %127 : vector<16x128xf32>
    %c0_100 = arith.constant 0 : index
    %c0_101 = arith.constant 0 : index
    %c0_102 = arith.constant 0 : index
    %129 = vector.load %arg14[%c0_100, %c0_101, %c0_102] : memref<1x16x128xf32, #tpu.memory_space<vmem>>, vector<1x16x128xf32>
    %130 = vector.shape_cast %129 : vector<1x16x128xf32> to vector<16x128xf32>
    %131 = vector.shape_cast %128 : vector<16x128xf32> to vector<1x16x128xf32>
    tpu.vector_store %arg14[%c0_100, %c0_101, %c0_102], %131 {strides = array<i32>} : memref<1x16x128xf32, #tpu.memory_space<vmem>>, vector<1x16x128xf32>,
    return
  }
  func.func @transform_0(%arg0: i32) -> (i32, i32, i32) {
    %c0_i32 = arith.constant 0 : i32
    %c0_i32_0 = arith.constant 0 : i32
    %c0_i32_1 = arith.constant 0 : i32
    return %arg0, %c0_i32, %c0_i32_0 : i32, i32, i32
  }
  func.func @transform_1(%arg0: i32) -> (i32, i32, i32) {
    %c0_i32 = arith.constant 0 : i32
    %c0_i32_0 = arith.constant 0 : i32
    %c0_i32_1 = arith.constant 0 : i32
    %c0_i32_2 = arith.constant 0 : i32
    return %c0_i32, %c0_i32_0, %c0_i32_1 : i32, i32, i32
  }
  func.func @transform_2(%arg0: i32) -> (i32, i32, i32) {
    %c0_i32 = arith.constant 0 : i32
    %c0_i32_0 = arith.constant 0 : i32
    %c0_i32_1 = arith.constant 0 : i32
    %c0_i32_2 = arith.constant 0 : i32
    return %c0_i32, %c0_i32_0, %c0_i32_1 : i32, i32, i32
  }
  func.func @transform_3(%arg0: i32) -> (i32, i32) {
    %c0_i32 = arith.constant 0 : i32
    %c0_i32_0 = arith.constant 0 : i32
    %c0_i32_1 = arith.constant 0 : i32
    return %c0_i32, %c0_i32_0 : i32, i32
  }
  func.func @transform_4(%arg0: i32) -> (i32, i32, i32) {
    %c0_i32 = arith.constant 0 : i32
    %c0_i32_0 = arith.constant 0 : i32
    %c0_i32_1 = arith.constant 0 : i32
    %c0_i32_2 = arith.constant 0 : i32
    return %c0_i32, %c0_i32_0, %c0_i32_1 : i32, i32, i32
  }
  func.func @transform_5(%arg0: i32) -> (i32, i32) {
    %c0_i32 = arith.constant 0 : i32
    %c0_i32_0 = arith.constant 0 : i32
    %c0_i32_1 = arith.constant 0 : i32
    return %c0_i32, %c0_i32_0 : i32, i32
  }
  func.func @transform_6(%arg0: i32) -> (i32, i32) {
    %c0_i32 = arith.constant 0 : i32
    %c0_i32_0 = arith.constant 0 : i32
    %c0_i32_1 = arith.constant 0 : i32
    return %c0_i32, %c0_i32_0 : i32, i32
  }
  func.func @transform_7(%arg0: i32) -> (i32, i32) {
    %c0_i32 = arith.constant 0 : i32
    %c0_i32_0 = arith.constant 0 : i32
    %c0_i32_1 = arith.constant 0 : i32
    return %c0_i32, %c0_i32_0 : i32, i32
  }
  func.func @transform_8(%arg0: i32) -> (i32, i32, i32) {
    %c0_i32 = arith.constant 0 : i32
    %c0_i32_0 = arith.constant 0 : i32
    %c0_i32_1 = arith.constant 0 : i32
    %c0_i32_2 = arith.constant 0 : i32
    return %c0_i32, %c0_i32_0, %c0_i32_1 : i32, i32, i32
  }
  func.func @transform_9(%arg0: i32) -> (i32, i32, i32) {
    %c0_i32 = arith.constant 0 : i32
    %c0_i32_0 = arith.constant 0 : i32
    %c0_i32_1 = arith.constant 0 : i32
    %c0_i32_2 = arith.constant 0 : i32
    return %c0_i32, %c0_i32_0, %c0_i32_1 : i32, i32, i32
  }
  func.func @transform_10(%arg0: i32) -> (i32, i32) {
    %c0_i32 = arith.constant 0 : i32
    %c0_i32_0 = arith.constant 0 : i32
    %c0_i32_1 = arith.constant 0 : i32
    return %c0_i32, %c0_i32_0 : i32, i32
  }
  func.func @transform_11(%arg0: i32) -> (i32, i32, i32) {
    %c0_i32 = arith.constant 0 : i32
    %c0_i32_0 = arith.constant 0 : i32
    %c0_i32_1 = arith.constant 0 : i32
    %c0_i32_2 = arith.constant 0 : i32
    return %c0_i32, %c0_i32_0, %c0_i32_1 : i32, i32, i32
  }
  func.func @transform_12(%arg0: i32) -> (i32, i32) {
    %c0_i32 = arith.constant 0 : i32
    %c0_i32_0 = arith.constant 0 : i32
    %c0_i32_1 = arith.constant 0 : i32
    return %c0_i32, %c0_i32_0 : i32, i32
  }
  func.func @transform_13(%arg0: i32) -> (i32, i32, i32) {
    %c0_i32 = arith.constant 0 : i32
    %c0_i32_0 = arith.constant 0 : i32
    %c0_i32_1 = arith.constant 0 : i32
    return %arg0, %c0_i32, %c0_i32_0 : i32, i32, i32
  }
}

</mosaic_0001>

<bundles_post_ra>
// kernel: tpu_custom_call.1
= control target key start
LH: loop header
LB: loop body
LE: loop exit
PB: predicated region body
PF: predicated region fallthrough
CT: control target
= control target key end

     0   :  { %s2947_s0 = inlined_call_operand.hbm [shape: f32[2,16,64], index: 0, kind: input, shape index: {}]   ;;  %s2948_s1 = inlined_call_operand.hbm [shape: bf16[3,16,16], index: 1, kind: input, shape index: {}]   ;;  %s2949_s2 = inlined_call_operand.vmem [shape: bf16[3,64,64], index: 2, kind: input, shape index: {}]   ;;  %s2950_s3 = inlined_call_operand.hbm [shape: f32[1,64], index: 3, kind: input, shape index: {}]   ;;  %s2951_s4 = inlined_call_operand.vmem [shape: bf16[3,64,128], index: 4, kind: input, shape index: {}]   ;;  %s2952_s5 = inlined_call_operand.vmem [shape: f32[1,128], index: 5, kind: input, shape index: {}]   ;;  %s2953_s6 = inlined_call_operand.hbm [shape: bf16[64,128], index: 6, kind: input, shape index: {}]   ;;  %s2954_s7 = inlined_call_operand.vmem [shape: f32[1,128], index: 7, kind: input, shape index: {}]   ;;  %s2955_s8 = inlined_call_operand.hbm [shape: bf16[3,16,16], index: 8, kind: input, shape index: {}]   ;;  %s2956_s9 = inlined_call_operand.vmem [shape: bf16[3,128,64], index: 9, kind: input, shape index: {}]   ;;  %s2957_s10 = inlined_call_operand.vmem [shape: f32[1,64], index: 10, kind: input, shape index: {}]   ;;  %s2958_s11 = inlined_call_operand.vmem [shape: bf16[3,64,128], index: 11, kind: input, shape index: {}]   ;;  %s2959_s12 = inlined_call_operand.vmem [shape: f32[1,128], index: 12, kind: input, shape index: {}]   ;;  %s2960_s13 = inlined_call_operand.hbm [shape: f32[2,16,128], index: 13, kind: output, shape index: {}]  }
   0x1   :  { %2964 = sst [smem:[#allocation18_spill]] %s2948_s1 }
   0x2   :  { %2965 = sst [smem:[#allocation19_spill]] %s2950_s3 }
   0x3   :  { %2966 = sst [smem:[#allocation20_spill]] %s2953_s6 }
   0x4   :  { %2967 = sst [smem:[#allocation21_spill]] %s2955_s8 }
   0x5   :  { %2968 = sst [smem:[#allocation22_spill]] %s2960_s13 }
   0x6   :  { %18 = vsyncpa [#allocation3], 0 }
   0x7   :  { %20 = vsyncpa [#allocation3 + $0x1], 0 }
   0x8   :  { %21 = vsyncpa [#allocation6], 0 }
   0x9   :  { %22 = vsyncpa [#allocation9], 0 }
   0xa   :  { %23 = vsyncpa [#allocation4], 0 }
   0xb   :  { %25 = vsyncpa [#allocation4 + $0x1], 0  ;;  %s2540_s25 = smov 0   ;;  %s2542_s26 = smov 0  }
   0xc   :  { %s2544_s27 = smov 0   ;;  %s2546_s28 = smov 0  }
   0xd LB: > { %2969 = sst [smem:[#allocation16_spill]] %s2446_s25  ;;  %s2561_s29 = sadd.s32 4294967295, %s2458_s28   ;;  %s2458_s28 = sphi %s2546_s28, %s2988_s28   ;;  %s2454_s27 = sphi %s2544_s27, %s2987_s27   ;;  %s2450_s26 = sphi %s2542_s26, %s2986_s26   ;;  %s2446_s25 = sphi %s2540_s25, %s2985_s25  }
   0xe   : > { %s1642_s30 = sadd.s32 4294967294, %s2458_s28   ;;  %p51_p0 = scmp.ne.s32.totalorder %s2450_s26, %s2446_s25 }
   0xf   : > { %p52_p1 = scmp.eq.s32.totalorder %s2561_s29, 0  ;;  %p327_p2 = scmp.eq.s32.totalorder %s2561_s29, 1 }
  0x10   : > { %p333_p3 = scmp.eq.s32.totalorder %s1642_s30, 1  ;;  %p1643_p5 = scmp.ge.s32.totalorder %s2458_s28, 1 }
  0x11   : > { %p2570_p4 = por %p52_p1, %p51_p0  ;;  %p340_p7 = scmp.lt.s32.totalorder %s2458_s28, 3 }
  0x12   : > { %p2575_p6 = por %p333_p3, %p51_p0  ;;  %s2973_s1 = sld [smem:[#allocation18_spill]] }
  0x13   : > { %p2583_p8 = pnand %p1643_p5, %p340_p7  ;;  %s2460_s20 = smov [#allocation5]  }
  0x14   : > { %s2971_s15 = scalar_select %p2575_p6, 1, 0 }
  0x15   : > { %p2124_p9 = pneg %p2583_p8  ;;  %s353_s21 = sshll.u32 %s2460_s20, 4  ;;  %s354_s21 = int_to_ptr.vmem [resolvable:$true] %s353_s21 }
  0x16   : > { %2972 = sst [smem:[#allocation17_spill]] %s2971_s15  ;;  %s2461_s16 = smov 64  }
  0x17   : > { %p2591_p10 = pnand %p2124_p9, %p52_p1  ;;  %s2976_s6 = sld [smem:[#allocation20_spill]] }
  0x18   : > { %s351_s18 = sshll.u32 %s2973_s1, 4  ;;  %s2462_s17 = smov 4   ;;  %s352_s18 = int_to_ptr.hbm [resolvable:$true] %s351_s18 }
  0x19   : > { %2127 = dma.hbm_to_vmem [thread:$0]  (!%p2591_p10), %s352_s18, 384, %s354_s21, [#allocation6], %s2461_s16, %s2461_s16, %s2462_s17  }
  0x1a   : > { %s2463_s20 = smov [#allocation8]   ;;  %s2977_s3 = sld [smem:[#allocation19_spill]] }
  0x1b   : > { %s388_s1 = sshll.u32 %s2463_s20, 4  ;;  %s2978_s8 = sld [smem:[#allocation21_spill]]  ;;  %s389_s1 = int_to_ptr.vmem [resolvable:$true] %s388_s1 }
  0x1c   : > { %s2464_s21 = smov [#allocation7]   ;;  %s2465_s25 = smov [#allocation10]  }
  0x1d   : > { %s386_s30 = sshll.u32 %s2976_s6, 4  ;;  %s371_s20 = sshll.u32 %s2464_s21, 4  ;;  %s387_s30 = int_to_ptr.hbm [resolvable:$true] %s386_s30  ;;  %s372_s20 = int_to_ptr.vmem [resolvable:$true] %s371_s20 }
  0x1e   : > { %2133 = dma.hbm_to_vmem [thread:$0]  (!%p2591_p10), %s387_s30, 512, %s389_s1, [#allocation9], %s2461_s16, %s2461_s16, %s2462_s17  }
  0x1f   : > { %s405_s15 = sshll.u32 %s2465_s25, 4  ;;  %s2614_s1 = sadd.s32 1, %s2458_s28   ;;  %s406_s15 = int_to_ptr.vmem [resolvable:$true] %s405_s15 }
  0x20   : > { %s369_s13 = sshll.u32 %s2977_s3, 4  ;;  %s38_s30 = sadd.s32 1, %s2454_s27  ;;  %s370_s13 = int_to_ptr.hbm [resolvable:$true] %s369_s13 }
  0x21   : > { %s403_s18 = sshll.u32 %s2978_s8, 4  ;;  %s35_s23 = ssub.s32 %s2458_s28, %s2614_s1  ;;  %s404_s18 = int_to_ptr.hbm [resolvable:$true] %s403_s18 }
  0x22   : > { %2130 = dma.hbm_to_vmem [thread:$0]  (!%p2591_p10), %s370_s13, 16, %s372_s20, [#allocation6]  }
  0x23   : > { %2136 = dma.hbm_to_vmem [thread:$0]  (!%p2591_p10), %s404_s18, 384, %s406_s15, [#allocation9], %s2461_s16, %s2461_s16, %s2462_s17  }
  0x24   : > { %p45_p12 = scmp.ne.s32.totalorder %s2454_s27, %s2450_s26  ;;  %p36_p13 = scmp.eq.s32.totalorder %s35_s23, 0 }
  0x25   : > { %p46_p0 = scmp.eq.s32.totalorder %s2458_s28, 0  ;;  %p2149_p5 = scmp.lt.s32.totalorder %s2458_s28, 2 }
  0x26   : > { %p2624_p3 = por %p327_p2, %p45_p12  ;;  %s431_s21 = sand.u32 1, %s2454_s27  }
  0x27   : > { %s2630_s13 = scalar_select %p36_p13, %s2454_s27, %s38_s30  }
  0x28   : > { %p47_p7 = por %p46_p0, %p45_p12  ;;  %s1649_s22 = sshll.u32 %s431_s21, 4 }
  0x29   : > { %s2034_s16 = sshll.u32 %s2458_s28, 4  ;;  %s435_s25 = scalar_lea.vmem [#allocation2], %s1649_s22 }
  0x2a   : > { %s440_s20 = scalar_lea.hbm %s2947_s0, %s2034_s16  ;;  %s443_s15 = sshll.u32 %s435_s25, 4  ;;  %s444_s15 = int_to_ptr.vmem [resolvable:$true] %s443_s15 }
  0x2b   : > { %s441_s23 = sshll.u32 %s440_s20, 4  ;;  %p2637_p2 = pnand %p2149_p5, %p47_p7  ;;  %s442_s23 = int_to_ptr.hbm [resolvable:$true] %s441_s23 }
  0x2c   : > { %s432_s30 = scalar_lea.sflag [#allocation3], %s431_s21  ;;  %s2354_s6 = sshra.s32 %s442_s23, 4  ;;  %s2355_s6 = int_to_ptr.hbm [resolvable:$true] %s2354_s6 }
  0x2d   : > { %s2356_s8 = scalar_lea.hbm %s2355_s6, 16  ;;  %p2358_p10 = pneg %p2637_p2 }
  0x2e   : > { %p2357_p9 = scmp.ne.s32.totalorder %s2355_s6, %s2356_s8  ;;  %s2361_s17 = scalar_lea.hbm %s2947_s0, 32 }
  0x2f   : > { %p2362_p0 = scmp.lt.s32.totalorder %s2355_s6, %s2947_s0  ;;  %p2363_p5 = scmp.lt.s32.totalorder %s2361_s17, %s2356_s8 }
  0x30   : > { %p2359_p12 = pnand %p2358_p10, %p2357_p9 }
  0x31   : > { %p2364_p7 = por %p2363_p5, %p2362_p0 }
  0x32   : > { %p2360_p13 = pneg %p2359_p12 }
  0x34   : > { %p2365_p11 = pnand %p2364_p7, %p2360_p13 }
  0x36   : > { %2368 = shalt.err (!%p2365_p11)
}
  0x37   : > { %s2466_s21 = smov 128   ;;  %s2467_s25 = smov 8  }
  0x38   : > { %2140 = dma.hbm_to_vmem [thread:$0]  (!%p2637_p2), %s442_s23, 256, %s444_s15, %s432_s30, %s2466_s21, %s2466_s21, %s2467_s25  }
  0x39   : > { %455 = sbr.rel (%p2583_p8) target bundleno = 1338 (0x53a), region = 72  ;;  %s2654_s16 = sand.u32 (!%p2583_p8), 1, %s2450_s26  }
  0x3a   : > { %s1653_s6 = sshll.u32 (!%p2583_p8), %s2654_s16, 4  ;;  %s458_s8 = scalar_lea.sflag (!%p2583_p8), [#allocation3], %s2654_s16 }
  0x3b   : > { %s461_s22 = scalar_lea.vmem (!%p2583_p8), [#allocation2], %s1653_s6 }
  0x3e   : > { %2429 = dma.done.wait (%p2570_p4), %s458_s8, 256  }
  0x3f   : > { %2431 = vsyncadd (%p2570_p4), %s458_s8, 4294967040 }
  0x40   : > { %2433 = dma.done.wait (%p52_p1), [#allocation6], 400  }
  0x41   : > { %2435 = vsyncadd (%p52_p1), [#allocation6], 4294966896 }
  0x42   : > { %2437 = dma.done.wait (%p52_p1), [#allocation9], 896  }
  0x43   : > { %2439 = vsyncadd (%p52_p1), [#allocation9], 4294966400  ;;  %v526_v0 = vld [vmem:[%s461_s22] sm:$0xff]  ;;  %v527_v1 = vld [vmem:[%s461_s22 + $0x8] sm:$0xff]  ;;  %vm536_vm0 = vcmask 130048   ;;  %vm596_vm1 = vcmask 523264  }
  0x44   : > { %v2672_v2 = vpack.c.bf16 %v527_v1, %v526_v0  ;;  %v2674_v3 = vld [vmem:[#allocation5] sm:$0xff]  ;;  %v2043_v4 = vld [vmem:[%s2949_s2 + $0x38] sm:$0xff]  ;;  %v2682_v6 = vld [vmem:[#allocation5 + $0x10] sm:$0xff]  ;;  %s2103_s8 = sshll.u32 %s2561_s29, 4  ;;  %s524_s22 = scalar_lea.vmem [#allocation11], %s1653_s6 }
  0x45   : > { %v2039_v5 = vld [vmem:[%s2949_s2 + $0x18] sm:$0xff]  ;;  %604 = vmatpush.bf16.msra.mxu1 %v2043_v4  ;;  %v2042_v7 = vld [vmem:[%s2949_s2 + $0x30] sm:$0xff]  ;;  %v2041_v9 = vld [vmem:[%s2949_s2 + $0x28] sm:$0xff]  ;;  %s2981_s19 = sld [smem:[#allocation22_spill]]  ;;  %s1528_s23 = sshll.u32 %s524_s22, 4  ;;  %s1529_s23 = int_to_ptr.vmem [resolvable:$true] %s1528_s23 }
  0x46   : > { %547 = vmatpush.bf16.msra.mxu0 %v2672_v2  ;;  %673 = vmatpush.bf16.msra.mxu3 %v2672_v2  ;;  %v2038_v8 = vld [vmem:[%s2949_s2 + $0x10] sm:$0xff]  ;;  %v2048_v10 = vld [vmem:[%s2949_s2 + $0x58] sm:$0xff]  ;;  %v2037_v11 = vld [vmem:[%s2949_s2 + $0x8] sm:$0xff]  ;;  %s1516_s17 = scalar_lea.sflag [#allocation4], %s2654_s16 }
  0x47   : > { %645 = vmatpush.bf16.msra.mxu2 %v2039_v5  ;;  %v2040_v12 = vld [vmem:[%s2949_s2 + $0x20] sm:$0xff]  ;;  %v2047_v13 = vld [vmem:[%s2949_s2 + $0x50] sm:$0xff]  ;;  %v2046_v15 = vld [vmem:[%s2949_s2 + $0x48] sm:$0xff] }
  0x48   : > { %v2036_v14 = vld [vmem:[%s2949_s2] sm:$0xff]  ;;  %v2056_v23 = vld [vmem:[%s2951_s4 + $0x38] sm:$0xff]  ;;  %v2055_v24 = vld [vmem:[%s2951_s4 + $0x30] sm:$0xff] }
  0x49   : > { %1663 = vmatmul.msk.bf16.vlgmr.msra.gmra.mxu0 %vm536_vm0, %v2674_v3  ;;  %1710 = vmatmul.msk.bf16.vlgmr.msra.gmra.mxu3 %vm536_vm0, %v2682_v6  ;;  %v2045_v16 = vld [vmem:[%s2949_s2 + $0x40] sm:$0xff]  ;;  %v2054_v26 = vld [vmem:[%s2951_s4 + $0x28] sm:$0xff]  ;;  %v2197_v30 = vld [vmem:[#allocation7] ss:$0 sm:$0xff] }
  0x4a   : > { %605 = vmatpush.bf16.msra.mxu1 %v2042_v7  ;;  %721 = vmatpush.bf16.msrb.mxu0 %v2048_v10  ;;  %v2053_v31 = vld [vmem:[%s2951_s4 + $0x20] sm:$0xff]  ;;  %v2060_v52 = vld [vmem:[%s2951_s4 + $0x58] sm:$0xff]  ;;  %v2059_v54 = vld [vmem:[%s2951_s4 + $0x50] sm:$0xff] }
  0x4b   : > { %646 = vmatpush.bf16.msra.mxu2 %v2038_v8  ;;  %v2052_v55 = vld [vmem:[%s2951_s4 + $0x18] sm:$0xff]  ;;  %v2058_v56 = vld [vmem:[%s2951_s4 + $0x48] sm:$0xff]  ;;  %v2051_v58 = vld [vmem:[%s2951_s4 + $0x10] sm:$0xff]  ;;  %s1527_s15 = scalar_lea.hbm %s2981_s19, %s2103_s8  ;;  %s2404_s21 = scalar_lea.hbm %s2981_s19, 32 }
  0x4c   : > { %v2064_v57 = vld [vmem:[#allocation8 + $0x18] sm:$0xff]  ;;  %v2057_v59 = vld [vmem:[%s2951_s4 + $0x40] sm:$0xff]  ;;  %v2063_v60 = vld [vmem:[#allocation8 + $0x10] sm:$0xff]  ;;  %s1530_s30 = sshll.u32 %s1527_s15, 4  ;;  %s1531_s30 = int_to_ptr.hbm [resolvable:$true] %s1530_s30 }
  0x4d   : > { %v2050_v61 = vld [vmem:[%s2951_s4 + $0x8] sm:$0xff]  ;;  %v2049_v63 = vld [vmem:[%s2951_s4] sm:$0xff]  ;;  %v2081_v8 = vld [vmem:[%s2956_s9 + $0x78] sm:$0xff]  ;;  %s2398_s18 = sshra.s32 %s1531_s30, 4  ;;  %s2399_s18 = int_to_ptr.hbm [resolvable:$true] %s2398_s18 }
  0x4e   : > { %606 = vmatpush.bf16.msra.mxu1 %v2041_v9  ;;  %722 = vmatpush.bf16.msrb.mxu0 %v2047_v13  ;;  %v2062_v62 = vld [vmem:[#allocation8 + $0x8] sm:$0xff]  ;;  %v2061_v0 = vld [vmem:[#allocation8] sm:$0xff]  ;;  %s2400_s29 = scalar_lea.hbm %s2399_s18, 16  ;;  %p2405_p11 = scmp.lt.s32.totalorder %s2399_s18, %s2981_s19 }
  0x4f   : > { %647 = vmatpush.bf16.msra.mxu2 %v2037_v11  ;;  %v2079_v10 = vld [vmem:[%s2956_s9 + $0x68] sm:$0xff]  ;;  %v2078_v11 = vld [vmem:[%s2956_s9 + $0x60] sm:$0xff]  ;;  %v2077_v13 = vld [vmem:[%s2956_s9 + $0x58] sm:$0xff]  ;;  %p2401_p1 = scmp.ne.s32.totalorder %s2399_s18, %s2400_s29  ;;  %p2406_p2 = scmp.lt.s32.totalorder %s2404_s21, %s2400_s29 }
  0x51   : > { %p2402_p4 = pnand %p2401_p1, %p2624_p3  ;;  %p2407_p9 = por %p2406_p2, %p2405_p11 }
  0x52   : > { %607 = vmatpush.bf16.msra.mxu1 %v2040_v12  ;;  %723 = vmatpush.bf16.msrb.mxu0 %v2046_v15  ;;  %v2198_v15 = vld [vmem:[%s2954_s7] ss:$0 sm:$0xff] }
  0x53   : > { %648 = vmatpush.bf16.msra.mxu2 %v2036_v14  ;;  %v2076_v14 = vld [vmem:[%s2956_s9 + $0x50] sm:$0xff]  ;;  %p2403_p8 = pneg %p2402_p4 }
  0x55   : > { %1688 = vmatmul.msk.bf16.vlgmr.msra.gmra.mxu1 %vm596_vm1, %v2672_v2  ;;  %p2408_p10 = pnand %p2407_p9, %p2403_p8 }
  0x56   : > { %724 = vmatpush.bf16.msrb.mxu0 %v2045_v16  ;;  %815 = vmatpush.bf16.msrb.mxu1 %v2056_v23 }
  0x57   : > { %856 = vmatpush.bf16.msrb.mxu2 %v2052_v55  ;;  %v2088_v55 = vld [vmem:[%s2956_s9 + $0xa8] sm:$0xff] }
  0x5a   : > { %816 = vmatpush.bf16.msrb.mxu1 %v2055_v24 }
  0x5b   : > { %857 = vmatpush.bf16.msrb.mxu2 %v2051_v58  ;;  %v2070_v58 = vld [vmem:[%s2956_s9 + $0x20] sm:$0xff] }
  0x5e   : > { %817 = vmatpush.bf16.msrb.mxu1 %v2054_v26 }
  0x5f   : > { %858 = vmatpush.bf16.msrb.mxu2 %v2050_v61  ;;  %v2084_v61 = vld [vmem:[%s2956_s9 + $0x88] sm:$0xff] }
  0x62   : > { %818 = vmatpush.bf16.msrb.mxu1 %v2053_v31 }
  0x63   : > { %859 = vmatpush.bf16.msrb.mxu2 %v2049_v63  ;;  %v2083_v63 = vld [vmem:[%s2956_s9 + $0x80] sm:$0xff] }
  0x66   : > { %979 = vmatpush.bf16.msra.mxu1 %v2064_v57  ;;  %v2086_v57 = vld [vmem:[%s2956_s9 + $0x98] sm:$0xff] }
  0x6a   : > { %980 = vmatpush.bf16.msra.mxu1 %v2063_v60  ;;  %v2069_v60 = vld [vmem:[%s2956_s9 + $0x18] sm:$0xff] }
  0x6e   : > { %981 = vmatpush.bf16.msra.mxu1 %v2062_v62  ;;  %v2068_v62 = vld [vmem:[%s2956_s9 + $0x10] sm:$0xff] }
  0x72   : > { %982 = vmatpush.bf16.msra.mxu1 %v2061_v0  ;;  %v2067_v0 = vld [vmem:[%s2956_s9 + $0x8] sm:$0xff] }
  0xc6   : > { %v549_v17 = vpop.f32.mrf.mxu0 }
  0xcc   : > { %v675_v18 = vpop.f32.mrf.mxu3 }
  0xce   : > { %v551_v19 = vpop.f32.mrf.mxu0 }
  0xcf   : > { %v554_v20 = vpack.c.bf16 %v551_v19, %v549_v17 }
  0xd1   : > { %1705 = vmatmul.msk.bf16.vlgmr.msra.gmra.mxu2 %vm596_vm1, %v554_v20  ;;  %v2199_v20 = vld [vmem:[%s2952_s5] ss:$0 sm:$0xff] }
  0xd2   : > { %v609_v25 = vpop.f32.mrf.mxu1 }
  0xd4   : > { %v677_v21 = vpop.f32.mrf.mxu3 }
  0xd5   : > { %v680_v22 = vpack.c.bf16 %v677_v21, %v675_v18  ;;  %v2075_v21 = vld [vmem:[%s2956_s9 + $0x48] sm:$0xff] }
  0xd7   : > { %1735 = vmatmul.msk.bf16.vlgmr.msrb.gmra.mxu0 %vm596_vm1, %v680_v22 }
  0xda   : > { %v611_v35 = vpop.f32.mrf.mxu1 }
 0x154   : > { %v650_v27 = vpop.f32.mrf.mxu2  ;;  %v726_v28 = vpop.f32.mrf.mxu0 }
 0x155   : > { %v651_v29 = vadd.f32 %v650_v27, %v609_v25  ;;  %v2074_v25 = vld [vmem:[%s2956_s9 + $0x40] sm:$0xff] }
 0x157   : > { %v731_v32 = vadd.f32 %v726_v28, %v651_v29 }
 0x159   : > { %v737_v33 = vadd.f32 %v2197_v30, %v731_v32 }
 0x15b   : > { %v739_v34 = vsub.f32 0.0, %v737_v33 }
 0x15c   : > { %v652_v36 = vpop.f32.mrf.mxu2  ;;  %v728_v39 = vpop.f32.mrf.mxu0 }
 0x15d   : > { %v741_v37 = vmul.f32 1.442695, %v739_v34  ;;  %v653_v38 = vadd.f32 %v652_v36, %v611_v35  ;;  %v2073_v36 = vld [vmem:[%s2956_s9 + $0x38] sm:$0xff] }
 0x15f   : > { %v732_v40 = vadd.f32 %v728_v39, %v653_v38  ;;  %2202 = vpow2.f32 %v741_v37  ;;  %v2072_v39 = vld [vmem:[%s2956_s9 + $0x30] sm:$0xff] }
 0x161   : > { %v738_v41 = vadd.f32 %v2197_v30, %v732_v40 }
 0x163   : > { %v740_v42 = vsub.f32 0.0, %v738_v41 }
 0x165   : > { %v743_v43 = vmul.f32 1.442695, %v740_v42  ;;  %v2203_v44 = vpop.eup %2202  ;;  %v2071_v42 = vld [vmem:[%s2956_s9 + $0x28] sm:$0xff] }
 0x166   : > { %v745_v45 = vadd.f32 1.0, %v2203_v44 }
 0x167   : > { %2204 = vpow2.f32 %v743_v43 }
 0x168   : > { %2206 = vrcp.f32 %v745_v45 }
 0x16d   : > { %v2205_v46 = vpop.eup %2204 }
 0x16e   : > { %v746_v47 = vadd.f32 1.0, %v2205_v46  ;;  %v2207_v48 = vpop.eup %2206 }
 0x16f   : > { %v749_v50 = vmul.f32 %v2207_v48, %v737_v33 }
 0x170   : > { %2208 = vrcp.f32 %v746_v47 }
 0x176   : > { %v2209_v49 = vpop.eup %2208 }
 0x177   : > { %v750_v51 = vmul.f32 %v2209_v49, %v738_v41 }
 0x179   : > { %v751_v53 = vpack.c.bf16 %v750_v51, %v749_v50  ;;  %v2090_v50 = vld [vmem:[%s2956_s9 + $0xb8] sm:$0xff] }
 0x17b   : > { %759 = vmatpush.bf16.msrb.mxu3 %v751_v53  ;;  %1761 = vmatmul.msk.bf16.vlgmr.msrb.gmra.mxu1 %vm596_vm1, %v751_v53 }
 0x17c   : > { %873 = vmatpush.bf16.msra.mxu0 %v751_v53  ;;  %v2819_v53 = vld [vmem:[#allocation10 + $0x10] sm:$0xff] }
 0x17e   : > { %1736 = vmatmul.msk.bf16.vlgmr.msrb.gmra.mxu3 %vm536_vm0, %v2674_v3 }
 0x17f   : > { %921 = vmatpush.bf16.msra.mxu3 %v2060_v52  ;;  %1779 = vmatmul.msk.bf16.vlgmr.msra.gmra.mxu0 %vm536_vm0, %v2682_v6  ;;  %v2817_v52 = vld [vmem:[#allocation10] sm:$0xff] }
 0x180   : > { %1110 = vmatpush.bf16.msrb.mxu0 %v2081_v8 }
 0x183   : > { %922 = vmatpush.bf16.msra.mxu3 %v2059_v54  ;;  %v2089_v54 = vld [vmem:[%s2956_s9 + $0xb0] sm:$0xff] }
 0x187   : > { %923 = vmatpush.bf16.msra.mxu3 %v2058_v56  ;;  %v2087_v56 = vld [vmem:[%s2956_s9 + $0xa0] sm:$0xff] }
 0x18b   : > { %924 = vmatpush.bf16.msra.mxu3 %v2057_v59  ;;  %1821 = vmatmul.msk.bf16.vlgmr.msra.gmra.mxu1 %vm596_vm1, %v2672_v2  ;;  %v2080_v2 = vld [vmem:[%s2956_s9 + $0x70] sm:$0xff] }
 0x18c   : > { %1111 = vmatpush.bf16.msrb.mxu0 %v2080_v2  ;;  %v2085_v59 = vld [vmem:[%s2956_s9 + $0x90] sm:$0xff] }
 0x18d   : > { %v2097_v2 = vld [vmem:[%s2958_s11 + $0x30] sm:$0xff] }
 0x18f   : > { %1172 = vmatpush.bf16.msrb.mxu3 %v2073_v36 }
 0x190   : > { %1112 = vmatpush.bf16.msrb.mxu0 %v2079_v10 }
 0x193   : > { %1173 = vmatpush.bf16.msrb.mxu3 %v2072_v39  ;;  %v2093_v39 = vld [vmem:[%s2958_s11 + $0x10] sm:$0xff] }
 0x194   : > { %1113 = vmatpush.bf16.msrb.mxu0 %v2078_v11  ;;  %v2096_v11 = vld [vmem:[%s2958_s11 + $0x28] sm:$0xff] }
 0x197   : > { %1174 = vmatpush.bf16.msrb.mxu3 %v2071_v42  ;;  %v2102_v42 = vld [vmem:[%s2958_s11 + $0x58] sm:$0xff] }
 0x198   : > { %1114 = vmatpush.bf16.msrb.mxu0 %v2077_v13 }
 0x19b   : > { %1175 = vmatpush.bf16.msrb.mxu3 %v2070_v58 }
 0x19c   : > { %1115 = vmatpush.bf16.msrb.mxu0 %v2076_v14 }
 0x19f   : > { %1176 = vmatpush.bf16.msrb.mxu3 %v2069_v60 }
 0x1a0   : > { %1116 = vmatpush.bf16.msrb.mxu0 %v2075_v21 }
 0x1a3   : > { %1177 = vmatpush.bf16.msrb.mxu3 %v2068_v62 }
 0x1a4   : > { %1117 = vmatpush.bf16.msrb.mxu0 %v2074_v25 }
 0x1a7   : > { %1178 = vmatpush.bf16.msrb.mxu3 %v2067_v0 }
 0x1f8   : > { %v820_v9 = vpop.f32.mrf.mxu1 }
 0x1fc   : > { %v875_v1 = vpop.f32.mrf.mxu0 }
 0x200   : > { %v822_v12 = vpop.f32.mrf.mxu1 }
 0x201   : > { %v761_v3 = vpop.f32.mrf.mxu3 }
 0x204   : > { %v877_v4 = vpop.f32.mrf.mxu0 }
 0x205   : > { %v880_v5 = vpack.c.bf16 %v877_v4, %v875_v1  ;;  %v2066_v1 = vld [vmem:[%s2956_s9] sm:$0xff] }
 0x206   : > { %1179 = vmatpush.bf16.msrb.mxu3 %v2066_v1 }
 0x207   : > { %1804 = vmatmul.msk.bf16.vlgmr.msra.gmra.mxu3 %vm596_vm1, %v880_v5 }
 0x208   : > { %v984_v16 = vpop.f32.mrf.mxu1 }
 0x209   : > { %v763_v6 = vpop.f32.mrf.mxu3  ;;  %v985_v22 = vadd.f32 %v2198_v15, %v984_v16 }
 0x20a   : > { %v766_v7 = vpack.c.bf16 %v763_v6, %v761_v3 }
 0x20c   : > { %1778 = vmatmul.msk.bf16.vlgmr.msrb.gmra.mxu2 %vm596_vm1, %v766_v7 }
 0x210   : > { %v986_v31 = vpop.f32.mrf.mxu1 }
 0x211   : > { %v987_v34 = vadd.f32 %v2198_v15, %v986_v31  ;;  %v2200_v15 = vld [vmem:[%s2957_s10] ss:$0 sm:$0xff] }
 0x28a   : > { %v926_v17 = vpop.f32.mrf.mxu3 }
 0x28f   : > { %v861_v18 = vpop.f32.mrf.mxu2 }
 0x290   : > { %v862_v19 = vadd.f32 %v861_v18, %v820_v9  ;;  %v2098_v9 = vld [vmem:[%s2958_s11 + $0x38] sm:$0xff] }
 0x291   : > { %1375 = vmatpush.bf16.msra.mxu0 %v2098_v9 }
 0x292   : > { %v931_v23 = vadd.f32 %v926_v17, %v862_v19  ;;  %v928_v30 = vpop.f32.mrf.mxu3  ;;  %v2095_v17 = vld [vmem:[%s2958_s11 + $0x20] sm:$0xff] }
 0x294   : > { %v937_v24 = vadd.f32 %v2199_v20, %v931_v23 }
 0x295   : > { %1376 = vmatpush.bf16.msra.mxu0 %v2097_v2 }
 0x296   : > { %v989_v26 = vadd.f32 %v985_v22, %v937_v24 }
 0x297   : > { %v863_v27 = vpop.f32.mrf.mxu2 }
 0x298   : > { %v991_v28 = vsub.f32 0.0, %v989_v26  ;;  %v864_v29 = vadd.f32 %v863_v27, %v822_v12 }
 0x299   : > { %1377 = vmatpush.bf16.msra.mxu0 %v2096_v11 }
 0x29a   : > { %v993_v32 = vmul.f32 1.442695, %v991_v28  ;;  %v932_v33 = vadd.f32 %v928_v30, %v864_v29 }
 0x29c   : > { %v938_v35 = vadd.f32 %v2199_v20, %v932_v33  ;;  %2210 = vpow2.f32 %v993_v32  ;;  %v2094_v33 = vld [vmem:[%s2958_s11 + $0x18] sm:$0xff] }
 0x29d   : > { %1378 = vmatpush.bf16.msra.mxu0 %v2095_v17  ;;  %1416 = vmatpush.bf16.msra.mxu3 %v2094_v33 }
 0x29e   : > { %v990_v37 = vadd.f32 %v987_v34, %v938_v35 }
 0x2a0   : > { %v992_v38 = vsub.f32 0.0, %v990_v37 }
 0x2a1   : > { %1417 = vmatpush.bf16.msra.mxu3 %v2093_v39 }
 0x2a2   : > { %v995_v40 = vmul.f32 1.442695, %v992_v38  ;;  %v2211_v41 = vpop.eup %2210 }
 0x2a3   : > { %v997_v43 = vadd.f32 1.0, %v2211_v41  ;;  %v2091_v41 = vld [vmem:[%s2958_s11] sm:$0xff] }
 0x2a4   : > { %2212 = vpow2.f32 %v995_v40  ;;  %v2092_v40 = vld [vmem:[%s2958_s11 + $0x8] sm:$0xff] }
 0x2a5   : > { %2214 = vrcp.f32 %v997_v43  ;;  %1418 = vmatpush.bf16.msra.mxu3 %v2092_v40  ;;  %v2101_v43 = vld [vmem:[%s2958_s11 + $0x50] sm:$0xff] }
 0x2a9   : > { %1419 = vmatpush.bf16.msra.mxu3 %v2091_v41 }
 0x2aa   : > { %v2213_v44 = vpop.eup %2212 }
 0x2ab   : > { %v998_v45 = vadd.f32 1.0, %v2213_v44  ;;  %v2215_v46 = vpop.eup %2214  ;;  %v2100_v44 = vld [vmem:[%s2958_s11 + $0x48] sm:$0xff] }
 0x2ac   : > { %v2808_v48 = vmul.f32 %v2215_v46, %v989_v26 }
 0x2ad   : > { %2216 = vrcp.f32 %v998_v45  ;;  %v2099_v45 = vld [vmem:[%s2958_s11 + $0x40] sm:$0xff] }
 0x2b3   : > { %v2217_v47 = vpop.eup %2216 }
 0x2b4   : > { %v2810_v49 = vmul.f32 %v2217_v47, %v990_v37 }
 0x2b6   : > { %v1003_v51 = vpack.c.bf16 %v2810_v49, %v2808_v48 }
 0x2b8   : > { %1021 = vmatpush.bf16.msra.mxu2 %v1003_v51  ;;  %1118 = vmatmul.bf16.vlgmr.msrb.gmra.mxu0 %v1003_v51 }
 0x2b9   : > { %1204 = vmatpush.bf16.msrb.mxu1 %v1003_v51 }
 0x2bb   : > { %1826 = vmatmul.msk.bf16.vlgmr.msra.gmra.mxu2 %vm536_vm0, %v2817_v52 }
 0x2bc   : > { %1277 = vmatpush.bf16.msrb.mxu2 %v2090_v50  ;;  %1911 = vmatmul.msk.bf16.vlgmr.msrb.gmra.mxu1 %vm536_vm0, %v2819_v53 }
 0x2c0   : > { %1278 = vmatpush.bf16.msrb.mxu2 %v2089_v54 }
 0x2c4   : > { %1279 = vmatpush.bf16.msrb.mxu2 %v2088_v55 }
 0x2c8   : > { %1280 = vmatpush.bf16.msrb.mxu2 %v2087_v56 }
 0x2cc   : > { %1281 = vmatpush.bf16.msrb.mxu2 %v2086_v57  ;;  %v2201_v57 = vld [vmem:[%s2959_s12] ss:$0 sm:$0xff] }
 0x2d0   : > { %1282 = vmatpush.bf16.msrb.mxu2 %v2085_v59 }
 0x2d4   : > { %1283 = vmatpush.bf16.msrb.mxu2 %v2084_v61 }
 0x2d8   : > { %1284 = vmatpush.bf16.msrb.mxu2 %v2083_v63 }
 0x2dc   : > { %1481 = vmatpush.bf16.msra.mxu2 %v2102_v42 }
 0x2e0   : > { %1482 = vmatpush.bf16.msra.mxu2 %v2101_v43 }
 0x2e4   : > { %1483 = vmatpush.bf16.msra.mxu2 %v2100_v44 }
 0x2e8   : > { %1484 = vmatpush.bf16.msra.mxu2 %v2099_v45 }
 0x335   : > { %v1119_v10 = vpop.f32.mrf.mxu0 }
 0x339   : > { %v1206_v3 = vpop.f32.mrf.mxu1 }
 0x33d   : > { %v1121_v20 = vpop.f32.mrf.mxu0 }
 0x33e   : > { %v1023_v4 = vpop.f32.mrf.mxu2 }
 0x341   : > { %v1208_v5 = vpop.f32.mrf.mxu1 }
 0x342   : > { %v1211_v6 = vpack.c.bf16 %v1208_v5, %v1206_v3 }
 0x344   : > { %1285 = vmatmul.bf16.vlgmr.msrb.gmra.mxu2 %v1211_v6 }
 0x346   : > { %v1025_v7 = vpop.f32.mrf.mxu2 }
 0x347   : > { %v1028_v8 = vpack.c.bf16 %v1025_v7, %v1023_v4 }
 0x349   : > { %1180 = vmatmul.bf16.vlgmr.msrb.gmra.mxu3 %v1028_v8 }
 0x3c7   : > { %v1286_v12 = vpop.f32.mrf.mxu2 }
 0x3cc   : > { %v1181_v13 = vpop.f32.mrf.mxu3 }
 0x3cd   : > { %v1182_v14 = vadd.f32 %v1181_v13, %v1119_v10 }
 0x3cf   : > { %v1291_v16 = vadd.f32 %v1286_v12, %v1182_v14  ;;  %v1288_v24 = vpop.f32.mrf.mxu2 }
 0x3d1   : > { %v1297_v18 = vadd.f32 %v2200_v15, %v1291_v16 }
 0x3d3   : > { %v1299_v19 = vsub.f32 0.0, %v1297_v18 }
 0x3d4   : > { %v1183_v21 = vpop.f32.mrf.mxu3 }
 0x3d5   : > { %v1301_v22 = vmul.f32 1.442695, %v1299_v19  ;;  %v1184_v23 = vadd.f32 %v1183_v21, %v1121_v20 }
 0x3d7   : > { %v1292_v25 = vadd.f32 %v1288_v24, %v1184_v23  ;;  %2218 = vpow2.f32 %v1301_v22 }
 0x3d9   : > { %v1298_v26 = vadd.f32 %v2200_v15, %v1292_v25 }
 0x3db   : > { %v1300_v27 = vsub.f32 0.0, %v1298_v26 }
 0x3dd   : > { %v1303_v28 = vmul.f32 1.442695, %v1300_v27  ;;  %v2219_v29 = vpop.eup %2218 }
 0x3de   : > { %v1305_v30 = vadd.f32 1.0, %v2219_v29 }
 0x3df   : > { %2220 = vpow2.f32 %v1303_v28 }
 0x3e0   : > { %2222 = vrcp.f32 %v1305_v30 }
 0x3e5   : > { %v2221_v31 = vpop.eup %2220 }
 0x3e6   : > { %v1306_v32 = vadd.f32 1.0, %v2221_v31  ;;  %v2223_v34 = vpop.eup %2222 }
 0x3e7   : > { %v1309_v36 = vmul.f32 %v2223_v34, %v1297_v18 }
 0x3e8   : > { %2224 = vrcp.f32 %v1306_v32 }
 0x3ee   : > { %v2225_v35 = vpop.eup %2224 }
 0x3ef   : > { %v1310_v37 = vmul.f32 %v2225_v35, %v1298_v26 }
 0x3f1   : > { %v1311_v38 = vpack.c.bf16 %v1310_v37, %v1309_v36 }
 0x3f3   : > { %1319 = vmatpush.bf16.msra.mxu1 %v1311_v38  ;;  %1985 = vmatmul.msk.bf16.vlgmr.msra.gmra.mxu0 %vm596_vm1, %v1311_v38 }
 0x3f6   : > { %1960 = vmatmul.msk.bf16.vlgmr.msra.gmra.mxu1 %vm536_vm0, %v2817_v52 }
 0x3f7   : > { %1433 = vmatpush.bf16.msrb.mxu1 %v1311_v38 }
 0x406   : > { %2003 = vmatmul.msk.bf16.vlgmr.msrb.gmra.mxu1 %vm536_vm0, %v2819_v53 }
 0x470   : > { %v1380_v55 = vpop.f32.mrf.mxu0 }
 0x473   : > { %v1321_v46 = vpop.f32.mrf.mxu1 }
 0x478   : > { %v1382_v63 = vpop.f32.mrf.mxu0 }
 0x47b   : > { %v1323_v47 = vpop.f32.mrf.mxu1 }
 0x47c   : > { %v1326_v50 = vpack.c.bf16 %v1323_v47, %v1321_v46 }
 0x47e   : > { %2002 = vmatmul.msk.bf16.vlgmr.msra.gmra.mxu3 %vm596_vm1, %v1326_v50 }
 0x483   : > { %v1435_v51 = vpop.f32.mrf.mxu1 }
 0x48b   : > { %v1437_v52 = vpop.f32.mrf.mxu1 }
 0x48c   : > { %v1440_v53 = vpack.c.bf16 %v1437_v52, %v1435_v51 }
 0x48e   : > { %2028 = vmatmul.msk.bf16.vlgmr.msra.gmra.mxu2 %vm596_vm1, %v1440_v53 }
 0x501   : > { %v1421_v54 = vpop.f32.mrf.mxu3 }
 0x502   : > { %v1422_v56 = vadd.f32 %v1421_v54, %v1380_v55 }
 0x509   : > { %v1423_v61 = vpop.f32.mrf.mxu3 }
 0x50a   : > { %v1424_v0 = vadd.f32 %v1423_v61, %v1382_v63 }
 0x511   : > { %v1486_v58 = vpop.f32.mrf.mxu2 }
 0x512   : > { %v1491_v59 = vadd.f32 %v1486_v58, %v1422_v56 }
 0x514   : > { %v1497_v60 = vadd.f32 %v2201_v57, %v1491_v59 }
 0x516   : > { %v1499_v62 = vadd.f32 %v1497_v60, %v2808_v48 }
 0x518   : > { %v1501_v1 = vsub.f32 0.0, %v1499_v62 }
 0x519   : > { %v1488_v3 = vpop.f32.mrf.mxu2 }
 0x51a   : > { %v1503_v4 = vmul.f32 1.442695, %v1501_v1  ;;  %v1492_v5 = vadd.f32 %v1488_v3, %v1424_v0 }
 0x51c   : > { %2226 = vpow2.f32 %v1503_v4  ;;  %v1498_v6 = vadd.f32 %v2201_v57, %v1492_v5 }
 0x51e   : > { %v1500_v7 = vadd.f32 %v1498_v6, %v2810_v49 }
 0x520   : > { %v1502_v8 = vsub.f32 0.0, %v1500_v7 }
 0x522   : > { %v2227_v9 = vpop.eup %2226  ;;  %v1505_v2 = vmul.f32 1.442695, %v1502_v8 }
 0x523   : > { %v1507_v10 = vadd.f32 1.0, %v2227_v9 }
 0x524   : > { %2228 = vpow2.f32 %v1505_v2 }
 0x525   : > { %2230 = vrcp.f32 %v1507_v10 }
 0x52a   : > { %v2229_v11 = vpop.eup %2228 }
 0x52b   : > { %v2231_v48 = vpop.eup %2230  ;;  %v1508_v12 = vadd.f32 1.0, %v2229_v11 }
 0x52c   : > { %v1511_v13 = vmul.f32 %v2231_v48, %v1499_v62 }
 0x52d   : > { %2232 = vrcp.f32 %v1508_v12 }
 0x52e   : > { %1513 = vst [vmem:[%s524_s22] sm:$0xff] %v1511_v13 }
 0x533   : > { %v2233_v49 = vpop.eup %2232 }
 0x534   : > { %v1512_v14 = vmul.f32 %v2233_v49, %v1500_v7 }
 0x536   : > { %1514 = vst [vmem:[%s524_s22 + $0x8] sm:$0xff] %v1512_v14 }
 0x537   : > { %2411 = shalt.err (!%p2408_p10)
}
 0x538   : > { %s2468_s16 = smov 128   ;;  %s2469_s22 = smov 8  }
 0x539   : > { %2122 = dma.vmem_to_hbm [thread:$0]  (%p2624_p3), %s1529_s23, 256, %s1531_s30, %s1516_s17, %s2468_s16, %s2468_s16, %s2469_s22  }
 0x53a PF: > { %s2982_s3 = sld [smem:[#allocation16_spill]]  ;;  %p2984_p12 = scmp.ge.s32.totalorder %s2458_s28, 2 }
 0x53c   : > { %p2142_p13 = pnand %p2984_p12, %p2575_p6 }
 0x53e   : > { %p2143_p0 = pneg %p2142_p13 }
 0x540   : > { %s1545_s15 = sand.u32 1, %s2982_s3  }
 0x541   : > { %s1546_s6 = scalar_lea.sflag [#allocation4], %s1545_s15 }
 0x542   : > { %2441 = dma.done.wait (%p2143_p0), %s1546_s6, 256  }
 0x543   : > { %2443 = vsyncadd (%p2143_p0), %s1546_s6, 4294967040  ;;  %p28_p5 = scmp.ge.s32.totalorder %s2614_s1, 4   ;;  %s2985_s25 = smov %s2450_s26 }
 0x544   : > { %s2986_s26 = smov %s2454_s27  ;;  %s2987_s27 = smov %s2630_s13 }
 0x545   : > { %s2988_s28 = smov %s2614_s1  ;;  %30 = sbr.rel (!%p28_p5) target bundleno = 13 (0xd), region = 143 }
 0x54a   :  { %1552 = vsyncpa [#allocation3], 1 }
 0x54b   :  { %1554 = vsyncpa [#allocation3 + $0x1], 1 }
 0x54c   :  { %1555 = vsyncpa [#allocation6], 1 }
 0x54d   :  { %1556 = vsyncpa [#allocation9], 1 }
 0x54e   :  { %1557 = vsyncpa [#allocation4], 1 }
 0x54f   :  { %1559 = vsyncpa [#allocation4 + $0x1], 1 }

</bundles_post_ra>
